<compile_context>
chip_gen: v7x
topology: tpu7x:2x2x1
jax: 0.10.0
libtpu: 0.0.40
codegen_flags: <defaults>
</compile_context>

<pallas_src>
import math
from functools import partial

import jax
import jax.numpy as jnp
from jax.experimental import pallas as pl
from jax.experimental.pallas import tpu as pltpu

BN_EPS = 1e-5


# ----------------------------------------------------------------------------
# Pallas kernels
# ----------------------------------------------------------------------------
def _apply_act(y, act, alpha):
    if act == 'relu':
        return jnp.maximum(y, 0.0)
    if act == 'prelu':
        return jnp.where(y >= 0.0, y, alpha * y)
    return y


def _mm_ep_kernel(act, alpha, has_res, res_pre, nsteps, k_valid, tk, *refs):
    """Tiled matmul.  Accumulates into the resident f32 output block; at the
    final K step applies scale/shift, optional fused residual and activation."""
    if has_res:
        a_ref, b_ref, s_ref, t_ref, r_ref, o_ref = refs
    else:
        a_ref, b_ref, s_ref, t_ref, o_ref = refs
        r_ref = None

    def epilogue(y):
        y = y * s_ref[...] + t_ref[...]
        if r_ref is not None and res_pre:
            y = y + r_ref[...]
        y = _apply_act(y, act, alpha)
        if r_ref is not None and not res_pre:
            y = y + r_ref[...]
        return y

    a = a_ref[...]
    b = b_ref[...]

    if nsteps == 1:
        # Fast path: no accumulator bookkeeping for single-K-step convs.
        o_ref[...] = epilogue(jnp.dot(a, b, preferred_element_type=jnp.float32))
        return

    k = pl.program_id(2)

    if k_valid is not None:
        # Ragged final K tile: zero-mask padded columns of A / rows of B.
        col = k * tk + jax.lax.broadcasted_iota(jnp.int32, (1, tk), 1)
        a = jnp.where(col < k_valid, a, 0)
        row = k * tk + jax.lax.broadcasted_iota(jnp.int32, (tk, 1), 0)
        b = jnp.where(row < k_valid, b, 0)

    @pl.when(k == 0)
    def _():
        o_ref[...] = jnp.zeros_like(o_ref)

    o_ref[...] += jnp.dot(a, b, preferred_element_type=jnp.float32)

    @pl.when(k == nsteps - 1)
    def _():
        o_ref[...] = epilogue(o_ref[...])


def _pick_tile(n, candidates):
    for c in candidates:
        if n % c == 0:
            return c
    return n


def pallas_matmul_ep(a, b, scale, shift, act='none', alpha=0.25,
                     residual=None, res_pre=True):
    """a:(M,K) bf16 @ b:(K,N) bf16 -> (M,N) f32 with per-column scale/shift,
    optional fused residual add and activation."""
    M, K = a.shape
    _, N = b.shape

    TM = 256 if M >= 256 else M
    TN = _pick_tile(N, (256, 128))
    if K <= 512:
        TK, nsteps, k_valid = K, 1, None
    else:
        TK = 512
        nsteps = (K + TK - 1) // TK
        k_valid = K if (K % TK) != 0 else None

    grid = ((M + TM - 1) // TM, (N + TN - 1) // TN, nsteps)

    s2 = scale.reshape(1, N).astype(jnp.float32)
    t2 = shift.reshape(1, N).astype(jnp.float32)

    in_specs = [pl.BlockSpec((TM, TK), lambda i, j, k: (i, k)),
                pl.BlockSpec((TK, TN), lambda i, j, k: (k, j)),
                pl.BlockSpec((1, TN), lambda i, j, k: (0, j)),
                pl.BlockSpec((1, TN), lambda i, j, k: (0, j))]
    args = [a, b, s2, t2]
    if residual is not None:
        in_specs.append(pl.BlockSpec((TM, TN), lambda i, j, k: (i, j)))
        args.append(residual.astype(jnp.float32))

    return pl.pallas_call(
        partial(_mm_ep_kernel, act, float(alpha), residual is not None,
                res_pre, nsteps, k_valid, TK),
        out_shape=jax.ShapeDtypeStruct((M, N), jnp.float32),
        grid_spec=pltpu.PrefetchScalarGridSpec(
            num_scalar_prefetch=0,
            grid=grid,
            in_specs=in_specs,
            out_specs=pl.BlockSpec((TM, TN), lambda i, j, k: (i, j))),
        compiler_params=pltpu.CompilerParams(
            dimension_semantics=("parallel", "parallel", "arbitrary")),
    )(*args)


def _pam_kernel(gamma, n_valid, tk,
                q_ref, k_ref, v_ref, x_ref, o_ref, m_sc, l_sc, acc_sc):
    """Flash-style spatial attention: grid (B, q-tiles, kv-tiles)."""
    kv = pl.program_id(2)

    @pl.when(kv == 0)
    def _():
        m_sc[...] = jnp.full_like(m_sc, -jnp.inf)
        l_sc[...] = jnp.zeros_like(l_sc)
        acc_sc[...] = jnp.zeros_like(acc_sc)

    q = q_ref[0]                                            # (TQ, Ck)
    k = k_ref[0]                                            # (TK, Ck)
    s = jax.lax.dot_general(q, k, (((1,), (1,)), ((), ())),
                            preferred_element_type=jnp.float32)   # (TQ, TK)
    if n_valid is not None:
        col = kv * tk + jax.lax.broadcasted_iota(jnp.int32, s.shape, 1)
        s = jnp.where(col < n_valid, s, -jnp.inf)

    m_prev = m_sc[...]
    m_new = jnp.maximum(m_prev, s.max(-1, keepdims=True))
    corr = jnp.exp(m_prev - m_new)
    p = jnp.exp(s - m_new)
    l_sc[...] = corr * l_sc[...] + p.sum(-1, keepdims=True)
    acc_sc[...] = corr * acc_sc[...] + jnp.dot(
        p.astype(v_ref.dtype), v_ref[0], preferred_element_type=jnp.float32)
    m_sc[...] = m_new

    @pl.when(kv == pl.num_programs(2) - 1)
    def _():
        inv = pl.reciprocal(l_sc[...], approx=True)
        o_ref[0] = (gamma * (acc_sc[...] * inv) + x_ref[0]).astype(o_ref.dtype)


def _cam_kernel(gamma, x_ref, o_ref):
    """Channel attention; energy is only (C,C)=(128,128) so x stays resident."""
    x = x_ref[0]                                            # (N, C)
    energy = jax.lax.dot_general(x, x, (((0,), (0,)), ((), ())),
                                 preferred_element_type=jnp.float32)  # (C, C)
    energy_new = jnp.max(energy, axis=-1, keepdims=True) - energy
    energy_new = energy_new - jnp.max(energy_new, axis=-1, keepdims=True)
    p = jnp.exp(energy_new)
    attn = p * pl.reciprocal(jnp.sum(p, axis=-1, keepdims=True), approx=True)
    # out[n, c1] = sum_c2 x[n, c2] * attn[c1, c2]
    out = jax.lax.dot_general(x, attn, (((1,), (1,)), ((), ())),
                              preferred_element_type=jnp.float32)     # (N, C)
    o_ref[0] = gamma * out + x


# ----------------------------------------------------------------------------
# Glue: im2col (NHWC), conv wrapper, pooling, upsampling
# ----------------------------------------------------------------------------
def im2col_nhwc(x, kh, kw, stride, padding, dilation):
    """x: (n,h,w,c) -> (n,ho,wo,kh*kw*c), tap-major / channel-minor."""
    # TODO(synk): fuse the kh*kw window expansion into the matmul kernel
    # (shifted-window index_map) to avoid materializing 9x patches in HBM.
    n, h, w, c = x.shape
    if kh == 1 and kw == 1 and stride == 1 and padding == 0:
        return x
    xp = jnp.pad(x, ((0, 0), (padding, padding), (padding, padding), (0, 0)))
    hp, wp = xp.shape[1], xp.shape[2]
    ho = (hp - (dilation * (kh - 1) + 1)) // stride + 1
    wo = (wp - (dilation * (kw - 1) + 1)) // stride + 1
    cols = []
    for i in range(kh):
        for j in range(kw):
            r0 = i * dilation
            c0 = j * dilation
            cols.append(xp[:, r0:r0 + (ho - 1) * stride + 1:stride,
                              c0:c0 + (wo - 1) * stride + 1:stride, :])
    patches = jnp.stack(cols, axis=3)                       # (n,ho,wo,T,c)
    return patches.reshape(n, ho, wo, kh * kw * c)


def conv2d(x, conv, bn=None, act='none', stride=1, padding=0, dilation=1,
           alpha=0.25, residual=None, res_pre=True):
    """NHWC conv via im2col + Pallas matmul with fused BN / bias / act /
    optional residual add.  Grouped convs use a block-diagonal dense weight."""
    w, bvec, groups = conv['w'], conv['b'], conv['groups']
    cout, cin_g, kh, kw = w.shape
    if bn is not None:
        s = bn['gamma'] / jnp.sqrt(bn['var'] + BN_EPS)
        t = bn['beta'] - bn['mean'] * s
    else:
        s = jnp.ones((cout,), jnp.float32)
        t = jnp.zeros((cout,), jnp.float32)
    if bvec is not None:
        t = t + bvec * s

    xb = x.astype(jnp.bfloat16)
    patches = im2col_nhwc(xb, kh, kw, stride, padding, dilation)
    n, ho, wo, K = patches.shape
    M = n * ho * wo
    A = patches.reshape(M, K)

    wb = w.astype(jnp.bfloat16)
    if groups == 1:
        Wm = wb.transpose(2, 3, 1, 0).reshape(K, cout)
    else:
        G = groups
        Og = cout // G
        Cg = cin_g
        T = kh * kw
        # wt[t, g, c, o] = w[g*Og+o, c, i, j]
        wt = wb.reshape(G, Og, Cg, kh, kw).transpose(3, 4, 0, 2, 1)
        wt = wt.reshape(T, G, Cg, Og)
        eye = jnp.eye(G, dtype=wb.dtype)
        dense = wt[:, :, :, None, :] * eye[None, :, None, :, None]
        Wm = dense.reshape(T * G * Cg, G * Og)               # block-diagonal

    r2 = None
    if residual is not None:
        r2 = residual.reshape(M, cout)

    out = pallas_matmul_ep(A, Wm, s, t, act=act, alpha=alpha,
                           residual=r2, res_pre=res_pre)
    return out.reshape(n, ho, wo, cout)


def maxpool_3x3_s2_p1(x):
    return jax.lax.reduce_window(x, -jnp.inf, jax.lax.max,
                                 (1, 3, 3, 1), (1, 2, 2, 1),
                                 ((0, 0), (1, 1), (1, 1), (0, 0)))


def upsample_bilinear(x, size):
    """F.upsample(mode='bilinear', align_corners=True) on NHWC tensors."""
    n, h, w, c = x.shape
    ho, wo = size
    if (ho, wo) == (h, w):
        return x

    def src(o, i):
        if o == 1:
            return jnp.zeros((1,), jnp.float32)
        return jnp.arange(o, dtype=jnp.float32) * ((i - 1) / (o - 1))

    ys = src(ho, h)
    xs = src(wo, w)
    y0 = jnp.floor(ys).astype(jnp.int32)
    y1 = jnp.minimum(y0 + 1, h - 1)
    x0 = jnp.floor(xs).astype(jnp.int32)
    x1 = jnp.minimum(x0 + 1, w - 1)
    wy = (ys - y0.astype(jnp.float32)).reshape(1, ho, 1, 1)
    wx = (xs - x0.astype(jnp.float32)).reshape(1, 1, wo, 1)
    tl = x[:, y0][:, :, x0]
    tr = x[:, y0][:, :, x1]
    bl = x[:, y1][:, :, x0]
    br = x[:, y1][:, :, x1]
    top = tl * (1 - wx) + tr * wx
    bot = bl * (1 - wx) + br * wx
    return top * (1 - wy) + bot * wy


# ----------------------------------------------------------------------------
# Attention modules
# ----------------------------------------------------------------------------
def pam_module(x, p):
    """Position attention (PAM): fused q/k/v projection + flash-style kernel."""
    B, H, W, C = x.shape
    N = H * W
    wq, wk, wv = p['q']['w'], p['k']['w'], p['v']['w']
    qkv_conv = {'w': jnp.concatenate([wq, wk, wv], axis=0),
                'b': jnp.concatenate([p['q']['b'], p['k']['b'], p['v']['b']]),
                'groups': 1}
    qkv = conv2d(x, qkv_conv, None, act='none')              # (B,H,W,160)
    qkv = qkv.reshape(B, N, 16 + 16 + C)
    q = qkv[:, :, :16].astype(jnp.bfloat16)
    k = qkv[:, :, 16:32].astype(jnp.bfloat16)
    v = qkv[:, :, 32:].astype(jnp.bfloat16)
    xf = x.reshape(B, N, C).astype(jnp.float32)

    TQ = min(N, 128)
    TK = min(N, 128)
    nq = (N + TQ - 1) // TQ
    nk = (N + TK - 1) // TK
    n_valid = N if (N % TK) != 0 else None

    out = pl.pallas_call(
        partial(_pam_kernel, float(p['gamma']), n_valid, TK),
        out_shape=jax.ShapeDtypeStruct((B, N, C), jnp.float32),
        grid_spec=pltpu.PrefetchScalarGridSpec(
            num_scalar_prefetch=0,
            grid=(B, nq, nk),
            in_specs=[pl.BlockSpec((1, TQ, 16), lambda b, i, j: (b, i, 0)),
                      pl.BlockSpec((1, TK, 16), lambda b, i, j: (b, j, 0)),
                      pl.BlockSpec((1, TK, C), lambda b, i, j: (b, j, 0)),
                      pl.BlockSpec((1, TQ, C), lambda b, i, j: (b, i, 0))],
            out_specs=pl.BlockSpec((1, TQ, C), lambda b, i, j: (b, i, 0)),
            scratch_shapes=[pltpu.VMEM((TQ, 1), jnp.float32),
                            pltpu.VMEM((TQ, 1), jnp.float32),
                            pltpu.VMEM((TQ, C), jnp.float32)]),
        compiler_params=pltpu.CompilerParams(
            dimension_semantics=("parallel", "parallel", "arbitrary")),
    )(q, k, v, xf)
    return out.reshape(B, H, W, C)


def cam_module(x, gamma):
    """Channel attention (CAM), batch as a grid axis."""
    # TODO(synk): tile the spatial (N) axis for very large resolutions
    # (two-pass energy reduction); at C=128 the resident block is small here.
    B, H, W, C = x.shape
    N = H * W
    xf = x.reshape(B, N, C).astype(jnp.float32)
    out = pl.pallas_call(
        partial(_cam_kernel, float(gamma)),
        out_shape=jax.ShapeDtypeStruct((B, N, C), jnp.float32),
        grid_spec=pltpu.PrefetchScalarGridSpec(
            num_scalar_prefetch=0,
            grid=(B,),
            in_specs=[pl.BlockSpec((1, N, C), lambda b: (b, 0, 0))],
            out_specs=pl.BlockSpec((1, N, C), lambda b: (b, 0, 0))),
        compiler_params=pltpu.CompilerParams(
            dimension_semantics=("parallel",)),
    )(xf)
    return out.reshape(B, H, W, C)


# ----------------------------------------------------------------------------
# Deterministic parameter construction
# ----------------------------------------------------------------------------
class ParamGen:
    def __init__(self, seed=0):
        self._key = jax.random.PRNGKey(seed)

    def normal(self, shape, scale):
        self._key, sub = jax.random.split(self._key)
        return jax.random.normal(sub, shape, dtype=jnp.float32) * scale


def make_conv(pg, cin, cout, k, groups=1, bias=False):
    fan_in = (cin // groups) * k * k
    w = pg.normal((cout, cin // groups, k, k), 1.0 / math.sqrt(fan_in))
    b = pg.normal((cout,), 0.05) if bias else None
    return {'w': w, 'b': b, 'groups': groups}


def make_bn(c):
    # PyTorch defaults for a freshly constructed BatchNorm2d in eval mode.
    return {'gamma': jnp.ones((c,), jnp.float32),
            'beta': jnp.zeros((c,), jnp.float32),
            'mean': jnp.zeros((c,), jnp.float32),
            'var': jnp.ones((c,), jnp.float32)}


def build_resnext50(pg):
    """ResNeXt50 32x4d backbone (layers split as in the ResNeXt50 wrapper)."""
    p = {'conv1': make_conv(pg, 3, 64, 7), 'bn1': make_bn(64)}
    layer_cfg = [(3, 128, 256, 1), (4, 256, 512, 2),
                 (6, 512, 1024, 2), (3, 1024, 2048, 2)]
    cin = 64
    for li, (nb, width, cout, stride) in enumerate(layer_cfg, start=1):
        blocks = []
        for bi in range(nb):
            s = stride if bi == 0 else 1
            blk = {'conv1': make_conv(pg, cin, width, 1), 'bn1': make_bn(width),
                   'conv2': make_conv(pg, width, width, 3, groups=32),
                   'bn2': make_bn(width),
                   'conv3': make_conv(pg, width, cout, 1), 'bn3': make_bn(cout),
                   's2': s, 'pad2': 1, 'dil2': 1, 'down': None}
            if bi == 0:
                blk['down'] = {'conv': make_conv(pg, cin, cout, 1),
                               'bn': make_bn(cout), 'stride': s}
            blocks.append(blk)
            cin = cout
        p['layer%d' % li] = blocks
    # _nostride_dilate: layer3 dilate=2, layer4 dilate=4
    for lname, dil in (('layer3', 2), ('layer4', 4)):
        for blk in p[lname]:
            if blk['s2'] == 2:
                blk['s2'] = 1
                blk['dil2'] = dil // 2
                blk['pad2'] = dil // 2
            else:
                blk['dil2'] = dil
                blk['pad2'] = dil
            if blk['down'] is not None and blk['down']['stride'] == 2:
                blk['down']['stride'] = 1
    return p


def build_head(pg):
    def conv_bn(cin, cout, k, bias=True):
        return {'conv': make_conv(pg, cin, cout, k, bias=bias),
                'bn': make_bn(cout)}

    h = {}
    h['reduce_low'] = [conv_bn(64 + 256 + 512, 128, 3),
                       conv_bn(128, 128, 3),
                       conv_bn(128, 128, 1)]
    h['reduce_high'] = [conv_bn(1024 + 2048, 512, 3),
                        conv_bn(512, 512, 3)]
    h['conv5a'] = conv_bn(512, 128, 3, bias=False)
    h['conv5c'] = conv_bn(512, 128, 3, bias=False)
    h['pam'] = {'q': make_conv(pg, 128, 16, 1, bias=True),
                'k': make_conv(pg, 128, 16, 1, bias=True),
                'v': make_conv(pg, 128, 128, 1, bias=True),
                'gamma': 0.1}
    h['cam_gamma'] = 0.1
    h['conv51'] = conv_bn(128, 128, 3, bias=False)
    h['conv52'] = conv_bn(128, 128, 3, bias=False)
    h['predict0'] = make_conv(pg, 128, 1, 1, bias=True)
    h['predict1'] = [conv_bn(129, 64, 3), conv_bn(64, 64, 3),
                     make_conv(pg, 64, 1, 1, bias=True)]
    h['predict2'] = [conv_bn(129, 64, 3), conv_bn(64, 64, 3),
                     make_conv(pg, 64, 1, 1, bias=True)]
    return h


# ----------------------------------------------------------------------------
# Forward pass (all tensors NHWC internally)
# ----------------------------------------------------------------------------
def bottleneck_fwd(x, blk):
    out = conv2d(x, blk['conv1'], blk['bn1'], act='relu')
    out = conv2d(out, blk['conv2'], blk['bn2'], act='relu',
                 stride=blk['s2'], padding=blk['pad2'], dilation=blk['dil2'])
    if blk['down'] is not None:
        identity = conv2d(x, blk['down']['conv'], blk['down']['bn'],
                          act='none', stride=blk['down']['stride'])
    else:
        identity = x
    # relu(bn3(conv3(out)) + identity), add fused before the activation.
    return conv2d(out, blk['conv3'], blk['bn3'], act='relu',
                  residual=identity, res_pre=True)


def backbone_fwd(x, bp):
    y = conv2d(x, bp['conv1'], bp['bn1'], act='relu', stride=2, padding=3)
    l0 = maxpool_3x3_s2_p1(y)
    feats = [l0]
    y = l0
    for lname in ('layer1', 'layer2', 'layer3', 'layer4'):
        for blk in bp[lname]:
            y = bottleneck_fwd(y, blk)
        feats.append(y)
    return feats


def r3net_forward(x_nchw, bp, hp):
    x = x_nchw.transpose(0, 2, 3, 1)                        # NCHW -> NHWC
    l0, l1, l2, l3, l4 = backbone_fwd(x, bp)
    l0_size = l0.shape[1:3]

    low_in = jnp.concatenate([l0,
                              upsample_bilinear(l1, l0_size),
                              upsample_bilinear(l2, l0_size)], axis=-1)
    rl = low_in
    for layer, pad in zip(hp['reduce_low'], (1, 1, 0)):
        rl = conv2d(rl, layer['conv'], layer['bn'], act='prelu', padding=pad)

    high_in = jnp.concatenate([l3,
                               upsample_bilinear(l4, l3.shape[1:3])], axis=-1)
    rh = high_in
    for layer in hp['reduce_high']:
        rh = conv2d(rh, layer['conv'], layer['bn'], act='prelu', padding=1)

    feat1 = conv2d(rh, hp['conv5a']['conv'], hp['conv5a']['bn'],
                   act='relu', padding=1)
    sa_feat = pam_module(feat1, hp['pam'])
    sa_conv = conv2d(sa_feat, hp['conv51']['conv'], hp['conv51']['bn'],
                     act='relu', padding=1)

    feat2 = conv2d(rh, hp['conv5c']['conv'], hp['conv5c']['bn'],
                   act='relu', padding=1)
    sc_feat = cam_module(feat2, hp['cam_gamma'])
    # sa_conv + relu(bn(conv52(sc_feat))): residual added after the activation.
    rh = conv2d(sc_feat, hp['conv52']['conv'], hp['conv52']['bn'],
                act='relu', padding=1, residual=sa_conv, res_pre=False)
    rh = upsample_bilinear(rh, l0_size)

    # TODO(synk): ConvGRU branch (reduce_high_motion / motion_high) is evaluated
    # in the reference forward but its output is never used in the returned
    # eval-mode prediction, so it is skipped.  GGNN branch unused (motion='GRU').

    predict0 = conv2d(rh, hp['predict0'], None, act='none')

    p1 = jnp.concatenate([predict0, rl], axis=-1)
    for layer in hp['predict1'][:2]:
        p1 = conv2d(p1, layer['conv'], layer['bn'], act='prelu', padding=1)
    predict1 = conv2d(p1, hp['predict1'][2], None, act='none',
                      residual=predict0)                    # fused + predict0

    p2 = jnp.concatenate([predict1, rh], axis=-1)
    for layer in hp['predict2'][:2]:
        p2 = conv2d(p2, layer['conv'], layer['bn'], act='prelu', padding=1)
    predict2 = conv2d(p2, hp['predict2'][2], None, act='none',
                      residual=predict1)                    # fused + predict1

    predict2 = upsample_bilinear(predict2, x.shape[1:3])
    out = jax.nn.sigmoid(predict2)                          # eval-mode return
    return out.transpose(0, 3, 1, 2)                        # NHWC -> NCHW


# ----------------------------------------------------------------------------
# Main
# ----------------------------------------------------------------------------
if __name__ == "__main__":
    pg = ParamGen(seed=0)
    backbone_params = build_resnext50(pg)
    head_params = build_head(pg)

    x = jax.random.normal(jax.random.PRNGKey(0), (2, 3, 32, 32), jnp.float32)

    out = r3net_forward(x, backbone_params, head_params)
    out = jax.block_until_ready(out)

    assert out.shape == (2, 1, 32, 32), out.shape
    assert bool(jnp.all(jnp.isfinite(out)))
    print("KERNEL_OK")
</pallas_src>

<mosaic_0001>
module attributes {stable_mosaic.version = 11 : i64} {
  func.func @_mm_ep_kernel(%arg0: i32, %arg1: i32, %arg2: i32, %arg3: memref<256x147xbf16, #tpu.memory_space<vmem>>, %arg4: memref<147x64xbf16, #tpu.memory_space<vmem>>, %arg5: memref<1x64xf32, #tpu.memory_space<vmem>>, %arg6: memref<1x64xf32, #tpu.memory_space<vmem>>, %arg7: memref<256x64xf32, #tpu.memory_space<vmem>>) attributes {dimension_semantics = [#tpu.dimension_semantics<parallel>, #tpu.dimension_semantics<parallel>, #tpu.dimension_semantics<arbitrary>], iteration_bounds = array<i64: 2, 1, 1>, scalar_prefetch = 0 : i64, scratch_operands = 0 : i64, tpu.core_type = #tpu.core_type<tc>, window_params = [{transform_indices = @transform_0, window_bounds = array<i64: 256, 147>}, {transform_indices = @transform_1, window_bounds = array<i64: 147, 64>}, {transform_indices = @transform_2, window_bounds = array<i64: 1, 64>}, {transform_indices = @transform_3, window_bounds = array<i64: 1, 64>}, {transform_indices = @transform_4, window_bounds = array<i64: 256, 64>}]} {
    %c0 = arith.constant 0 : index
    %c0_0 = arith.constant 0 : index
    %0 = vector.load %arg3[%c0, %c0_0] : memref<256x147xbf16, #tpu.memory_space<vmem>>, vector<256x147xbf16>
    %c0_1 = arith.constant 0 : index
    %c0_2 = arith.constant 0 : index
    %1 = vector.load %arg4[%c0_1, %c0_2] : memref<147x64xbf16, #tpu.memory_space<vmem>>, vector<147x64xbf16>
    %cst = arith.constant dense<0.000000e+00> : vector<256x64xf32>
    %2 = tpu.matmul %0, %1, %cst {dimension_numbers = #tpu.dot_dimension_numbers<[1], [0], [0], [1], [0, 0, 1, 1], [], []>} : vector<256x147xbf16>, vector<147x64xbf16>, vector<256x64xf32> -> vector<256x64xf32>
    %c0_3 = arith.constant 0 : index
    %c0_4 = arith.constant 0 : index
    %3 = vector.load %arg5[%c0_3, %c0_4] : memref<1x64xf32, #tpu.memory_space<vmem>>, vector<1x64xf32>
    %4 = vector.broadcast %3 : vector<1x64xf32> to vector<256x64xf32>
    %5 = arith.mulf %2, %4 : vector<256x64xf32>
    %c0_5 = arith.constant 0 : index
    %c0_6 = arith.constant 0 : index
    %6 = vector.load %arg6[%c0_5, %c0_6] : memref<1x64xf32, #tpu.memory_space<vmem>>, vector<1x64xf32>
    %7 = vector.broadcast %6 : vector<1x64xf32> to vector<256x64xf32>
    %8 = arith.addf %5, %7 : vector<256x64xf32>
    %cst_7 = arith.constant 0.000000e+00 : f32
    %9 = vector.broadcast %cst_7 : f32 to vector<256x64xf32>
    %10 = arith.maximumf %8, %9 : vector<256x64xf32>
    %c0_8 = arith.constant 0 : index
    %c0_9 = arith.constant 0 : index
    %11 = vector.load %arg7[%c0_8, %c0_9] : memref<256x64xf32, #tpu.memory_space<vmem>>, vector<256x64xf32>
    tpu.vector_store %arg7[%c0_8, %c0_9], %10 {strides = array<i32>} : memref<256x64xf32, #tpu.memory_space<vmem>>, vector<256x64xf32>,
    return
  }
  func.func @transform_0(%arg0: i32, %arg1: i32, %arg2: i32) -> (i32, i32) {
    %c0_i32 = arith.constant 0 : i32
    return %arg0, %arg2 : i32, i32
  }
  func.func @transform_1(%arg0: i32, %arg1: i32, %arg2: i32) -> (i32, i32) {
    %c0_i32 = arith.constant 0 : i32
    return %arg2, %arg1 : i32, i32
  }
  func.func @transform_2(%arg0: i32, %arg1: i32, %arg2: i32) -> (i32, i32) {
    %c0_i32 = arith.constant 0 : i32
    %c0_i32_0 = arith.constant 0 : i32
    return %c0_i32, %arg1 : i32, i32
  }
  func.func @transform_3(%arg0: i32, %arg1: i32, %arg2: i32) -> (i32, i32) {
    %c0_i32 = arith.constant 0 : i32
    %c0_i32_0 = arith.constant 0 : i32
    return %c0_i32, %arg1 : i32, i32
  }
  func.func @transform_4(%arg0: i32, %arg1: i32, %arg2: i32) -> (i32, i32) {
    %c0_i32 = arith.constant 0 : i32
    return %arg0, %arg1 : i32, i32
  }
}

</mosaic_0001>

<bundles_post_ra>
// kernel: tpu_custom_call.1
= control target key start
LH: loop header
LB: loop body
LE: loop exit
PB: predicated region body
PF: predicated region fallthrough
CT: control target
= control target key end

     0   :  { %s1278_s15 = smov 0   ;;  %s1280_s16 = smov 0   ;;  %s1538_s0 = inlined_call_operand.vmem [shape: bf16[512,147], index: 0, kind: input, shape index: {}]   ;;  %s1539_s1 = inlined_call_operand.vmem [shape: bf16[147,64], index: 1, kind: input, shape index: {}]   ;;  %s1540_s2 = inlined_call_operand.vmem [shape: f32[1,64], index: 2, kind: input, shape index: {}]   ;;  %s1541_s3 = inlined_call_operand.vmem [shape: f32[1,64], index: 3, kind: input, shape index: {}]   ;;  %s1542_s4 = inlined_call_operand.vmem [shape: f32[512,64], index: 4, kind: output, shape index: {}]  }
   0x1   :  { %s1282_s17 = smov 0  }
   0x2 LB: > { %s33_s18 = sadd.s32 1, %s1245_s16  ;;  %p1054_p0 = scmp.ge.s32.totalorder %s1249_s17, 1  ;;  %s1249_s17 = sphi %s1282_s17, %s14_s17   ;;  %s1245_s16 = sphi %s1280_s16, %s1544_s16   ;;  %s1241_s15 = sphi %s1278_s15, %s1543_s15  }
   0x3   : > { %p35_p1 = scmp.ge.s32.totalorder %s33_s18, 2  ;;  %p224_p2 = scmp.lt.s32.totalorder %s1249_s17, 3 }
   0x5   : > { %s1546_s18 = smov (%p35_p1, %s33_s18), 0  ;;  %p225_p3 = pnand %p1054_p0, %p224_p2 }
   0x6   : > { %v1169_v0 = vld [vmem:[%s1539_s1] sm:$0xff] (!%p225_p3)   ;;  %v1251_v1 = vmov (!%p225_p3), 0   ;;  %v1170_v2 = vld [vmem:[%s1539_s1 + $0x8] sm:$0xff] (!%p225_p3)   ;;  %v1171_v3 = vld [vmem:[%s1539_s1 + $0x10] sm:$0xff] (!%p225_p3)   ;;  %s1055_s25 = sshll.u32 (!%p225_p3), %s1241_s15, 5  ;;  %vm561_vm0 = vcmask (!%p225_p3), 154624  }
   0x7   : > { %228 = sbr.rel (%p225_p3) target bundleno = 324 (0x144), region = 36  ;;  %617 = vmatprep.subr.bf16.mxu0 (!%p225_p3), %v1251_v1  ;;  %1123 = vmatprep.subr.bf16.mxu1 (!%p225_p3), %v1251_v1  ;;  %p274_p4 = scmp.lt.s32.totalorder (!%p225_p3), %s1055_s25, 63  ;;  %v1172_v4 = vld [vmem:[%s1539_s1 + $0x18] sm:$0xff] (!%p225_p3)   ;;  %v1173_v5 = vld [vmem:[%s1539_s1 + $0x20] sm:$0xff] (!%p225_p3)   ;;  %v1174_v8 = vld [vmem:[%s1539_s1 + $0x28] sm:$0xff] (!%p225_p3)   ;;  %vm610_vm1 = vcmask (!%p225_p3), 1040384  }
   0x8   : > { %618 = vmatpush1.bf16.msra.mxu0 (!%p225_p3), %v1169_v0  ;;  %1133 = vmatpush1.bf16.msra.mxu1 (!%p225_p3), %v1169_v0  ;;  %v1175_v9 = vld [vmem:[%s1539_s1 + $0x30] sm:$0xff] (!%p225_p3)   ;;  %v1176_v10 = vld [vmem:[%s1539_s1 + $0x38] sm:$0xff] (!%p225_p3)   ;;  %vm611_vm2 = vcmask (!%p225_p3), 1041408   ;;  %v1252_v11 = vmov (!%p225_p3), 65535   ;;  %v1177_v13 = vld [vmem:[%s1539_s1 + $0x40] sm:$0xff] (!%p225_p3)   ;;  %vm888_vm3 = vcmask (!%p225_p3), 523264  }
   0x9   : > { %619 = vmatprep.subr.bf16.mxu0 (!%p225_p3), %v1251_v1  ;;  %1124 = vmatprep.subr.bf16.mxu1 (!%p225_p3), %v1251_v1  ;;  %v612_v12 = vsel (!%p225_p3), %vm610_vm1, 4294967295, %v1252_v11  ;;  %v1178_v14 = vld [vmem:[%s1539_s1 + $0x48] ss:$0 sps:$4 sm:$0x33] (!%p225_p3)   ;;  %v1387_v47 = vld [vmem:[%s1540_s2] ss:$0 sm:$0xff] (!%p225_p3) }
   0xa   : > { %v613_v15 = vsel (!%p225_p3), %vm611_vm2, %v612_v12, 0  ;;  %v1392_v49 = vld [vmem:[%s1541_s3] ss:$0 sm:$0xff] (!%p225_p3) }
   0xb   : > { %v615_v16 = vand.u32 (!%p225_p3), %v1178_v14, %v613_v15 }
   0xc   : > { %620 = vmatpush1.bf16.msra.mxu0 (!%p225_p3), %v1170_v2  ;;  %1134 = vmatpush1.bf16.msra.mxu1 (!%p225_p3), %v1170_v2 }
   0xd   : > { %621 = vmatprep.subr.bf16.mxu0 (!%p225_p3), %v1251_v1  ;;  %1125 = vmatprep.subr.bf16.mxu1 (!%p225_p3), %v1251_v1 }
   0xe   : > { %s1548_s25 = smov (!%p274_p4, %s1055_s25), 63 }
   0xf   : > { %s1122_s28 = sshll.u32 %s1548_s25, 3 }
  0x10   : > { %622 = vmatpush1.bf16.msra.mxu0 %v1171_v3  ;;  %1135 = vmatpush1.bf16.msra.mxu1 %v1171_v3  ;;  %s1316_s5 = scalar_lea.vmem %s1538_s0, %s1122_s28  ;;  %s1405_s29 = scalar_lea.vmem %s1542_s4, %s1122_s28 }
  0x11   : > { %623 = vmatprep.subr.bf16.mxu0 %v1251_v1  ;;  %1126 = vmatprep.subr.bf16.mxu1 %v1251_v1  ;;  %v1181_v6 = vld [vmem:[%s1316_s5 + $0x4] ss:$8 sps:$4 sm:$0xff]   ;;  %v1179_v17 = vld [vmem:[%s1316_s5] ss:$8 sps:$4 sm:$0xff]   ;;  %v1185_v19 = vld [vmem:[%s1316_s5 + $0x14] ss:$8 sps:$4 sm:$0xff]  }
  0x12   : > { %v1184_v7 = vld [vmem:[%s1316_s5 + $0x84] ss:$8 sps:$4 sm:$0xff]   ;;  %1102 = vmatprep.mubr.msk.bf16.mxu0 %vm561_vm0, %v1181_v6  ;;  %v1182_v18 = vld [vmem:[%s1316_s5 + $0x80] ss:$8 sps:$4 sm:$0xff]   ;;  %v1187_v20 = vld [vmem:[%s1316_s5 + $0x94] ss:$8 sps:$4 sm:$0xff]  }
  0x13   : > { %1110 = vmatprep.mubr.msk.bf16.mxu1 %vm561_vm0, %v1184_v7  ;;  %v1189_v21 = vld [vmem:[%s1316_s5 + $0x10] ss:$8 sps:$4 sm:$0xff]   ;;  %v1191_v23 = vld [vmem:[%s1316_s5 + $0x24] ss:$8 sps:$4 sm:$0xff]   ;;  %v1195_v25 = vld [vmem:[%s1316_s5 + $0x20] ss:$8 sps:$4 sm:$0xff]  }
  0x14   : > { %624 = vmatpush1.bf16.msra.mxu0 %v1172_v4  ;;  %1136 = vmatpush1.bf16.msra.mxu1 %v1172_v4  ;;  %v1190_v22 = vld [vmem:[%s1316_s5 + $0x90] ss:$8 sps:$4 sm:$0xff]   ;;  %v1193_v24 = vld [vmem:[%s1316_s5 + $0xa4] ss:$8 sps:$4 sm:$0xff]   ;;  %v1196_v26 = vld [vmem:[%s1316_s5 + $0xa0] ss:$8 sps:$4 sm:$0xff]  }
  0x15   : > { %625 = vmatprep.subr.bf16.mxu0 %v1251_v1  ;;  %1127 = vmatprep.subr.bf16.mxu1 %v1251_v1  ;;  %v1197_v27 = vld [vmem:[%s1316_s5 + $0x34] ss:$8 sps:$4 sm:$0xff]   ;;  %v1201_v29 = vld [vmem:[%s1316_s5 + $0x30] ss:$8 sps:$4 sm:$0xff]   ;;  %v1203_v31 = vld [vmem:[%s1316_s5 + $0x44] ss:$8 sps:$4 sm:$0xff]  }
  0x16   : > { %v1199_v28 = vld [vmem:[%s1316_s5 + $0xb4] ss:$8 sps:$4 sm:$0xff]   ;;  %v1202_v30 = vld [vmem:[%s1316_s5 + $0xb0] ss:$8 sps:$4 sm:$0xff]   ;;  %v1205_v32 = vld [vmem:[%s1316_s5 + $0xc4] ss:$8 sps:$4 sm:$0xff]  }
  0x17   : > { %v1207_v33 = vld [vmem:[%s1316_s5 + $0x40] ss:$8 sps:$4 sm:$0xff]   ;;  %v1209_v35 = vld [vmem:[%s1316_s5 + $0x54] ss:$8 sps:$4 sm:$0xff]   ;;  %v1213_v37 = vld [vmem:[%s1316_s5 + $0x50] ss:$8 sps:$4 sm:$0xff]  }
  0x18   : > { %626 = vmatpush1.bf16.msra.mxu0 %v1173_v5  ;;  %1137 = vmatpush1.bf16.msra.mxu1 %v1173_v5  ;;  %v1208_v34 = vld [vmem:[%s1316_s5 + $0xc0] ss:$8 sps:$4 sm:$0xff]   ;;  %v1211_v36 = vld [vmem:[%s1316_s5 + $0xd4] ss:$8 sps:$4 sm:$0xff]   ;;  %v1214_v38 = vld [vmem:[%s1316_s5 + $0xd0] ss:$8 sps:$4 sm:$0xff]  }
  0x19   : > { %627 = vmatprep.subr.bf16.mxu0 %v1251_v1  ;;  %1128 = vmatprep.subr.bf16.mxu1 %v1251_v1  ;;  %v1215_v39 = vld [vmem:[%s1316_s5 + $0x64] ss:$8 sps:$4 sm:$0xff]   ;;  %v1219_v41 = vld [vmem:[%s1316_s5 + $0x60] ss:$8 sps:$4 sm:$0xff]   ;;  %v1221_v43 = vld [vmem:[%s1316_s5 + $0x74] ss:$8 sps:$4 sm:$0xff]  }
  0x1a   : > { %v1217_v40 = vld [vmem:[%s1316_s5 + $0xe4] ss:$8 sps:$4 sm:$0xff]   ;;  %v1220_v42 = vld [vmem:[%s1316_s5 + $0xe0] ss:$8 sps:$4 sm:$0xff]   ;;  %v1223_v44 = vld [vmem:[%s1316_s5 + $0xf4] ss:$8 sps:$4 sm:$0xff]  }
  0x1b   : > { %v1225_v45 = vld [vmem:[%s1316_s5 + $0x70] ss:$8 sps:$4 sm:$0xff]  }
  0x1c   : > { %628 = vmatpush1.bf16.msra.mxu0 %v1174_v8  ;;  %1138 = vmatpush1.bf16.msra.mxu1 %v1174_v8  ;;  %v1226_v46 = vld [vmem:[%s1316_s5 + $0xf0] ss:$8 sps:$4 sm:$0xff]  }
  0x1d   : > { %629 = vmatprep.subr.bf16.mxu0 %v1251_v1  ;;  %1129 = vmatprep.subr.bf16.mxu1 %v1251_v1 }
  0x20   : > { %630 = vmatpush1.bf16.msra.mxu0 %v1175_v9  ;;  %1139 = vmatpush1.bf16.msra.mxu1 %v1175_v9 }
  0x21   : > { %631 = vmatprep.subr.bf16.mxu0 %v1251_v1  ;;  %1130 = vmatprep.subr.bf16.mxu1 %v1251_v1 }
  0x24   : > { %632 = vmatpush1.bf16.msra.mxu0 %v1176_v10  ;;  %1140 = vmatpush1.bf16.msra.mxu1 %v1176_v10 }
  0x25   : > { %633 = vmatprep.subr.bf16.mxu0 %v1251_v1  ;;  %1131 = vmatprep.subr.bf16.mxu1 %v1251_v1 }
  0x28   : > { %634 = vmatpush1.bf16.msra.mxu0 %v1177_v13  ;;  %1141 = vmatpush1.bf16.msra.mxu1 %v1177_v13 }
  0x29   : > { %635 = vmatprep.subr.bf16.mxu0 %v1251_v1  ;;  %1132 = vmatprep.subr.bf16.mxu1 %v1251_v1 }
  0x2c   : > { %636 = vmatpush1.bf16.msra.mxu0 %v615_v16  ;;  %1142 = vmatpush1.bf16.msra.mxu1 %v615_v16 }
  0x2f   : > { %650 = vmatmul.mubr.bf16.vlgmr.msra.gmra.mrb[0].mxu0 %v1179_v17  ;;  %714 = vmatmul.mubr.bf16.vlgmr.msra.gmra.mrb[0].mxu1 %v1182_v18 }
  0x30   : > { %1103 = vmatprep.mubr.msk.bf16.mxu0 %vm561_vm0, %v1185_v19  ;;  %1111 = vmatprep.mubr.msk.bf16.mxu1 %vm561_vm0, %v1187_v20 }
  0x37   : > { %658 = vmatmul.mubr.bf16.gmra.mrb[4].mxu0 %v1189_v21  ;;  %722 = vmatmul.mubr.bf16.gmra.mrb[4].mxu1 %v1190_v22 }
  0x38   : > { %1104 = vmatprep.mubr.msk.bf16.mxu0 %vm561_vm0, %v1191_v23  ;;  %1112 = vmatprep.mubr.msk.bf16.mxu1 %vm561_vm0, %v1193_v24 }
  0x3f   : > { %666 = vmatmul.mubr.bf16.gmra.mrb[8].mxu0 %v1195_v25  ;;  %730 = vmatmul.mubr.bf16.gmra.mrb[8].mxu1 %v1196_v26 }
  0x40   : > { %1105 = vmatprep.mubr.msk.bf16.mxu0 %vm561_vm0, %v1197_v27  ;;  %1113 = vmatprep.mubr.msk.bf16.mxu1 %vm561_vm0, %v1199_v28 }
  0x47   : > { %674 = vmatmul.mubr.bf16.gmra.mrb[12].mxu0 %v1201_v29  ;;  %738 = vmatmul.mubr.bf16.gmra.mrb[12].mxu1 %v1202_v30 }
  0x48   : > { %1106 = vmatprep.mubr.msk.bf16.mxu0 %vm561_vm0, %v1203_v31  ;;  %1114 = vmatprep.mubr.msk.bf16.mxu1 %vm561_vm0, %v1205_v32 }
  0x4f   : > { %682 = vmatmul.mubr.bf16.gmra.mrb[16].mxu0 %v1207_v33  ;;  %746 = vmatmul.mubr.bf16.gmra.mrb[16].mxu1 %v1208_v34 }
  0x50   : > { %1107 = vmatprep.mubr.msk.bf16.mxu0 %vm561_vm0, %v1209_v35  ;;  %1115 = vmatprep.mubr.msk.bf16.mxu1 %vm561_vm0, %v1211_v36 }
  0x57   : > { %690 = vmatmul.mubr.bf16.gmra.mrb[20].mxu0 %v1213_v37  ;;  %754 = vmatmul.mubr.bf16.gmra.mrb[20].mxu1 %v1214_v38 }
  0x58   : > { %1108 = vmatprep.mubr.msk.bf16.mxu0 %vm561_vm0, %v1215_v39  ;;  %1116 = vmatprep.mubr.msk.bf16.mxu1 %vm561_vm0, %v1217_v40 }
  0x5f   : > { %698 = vmatmul.mubr.bf16.gmra.mrb[24].mxu0 %v1219_v41  ;;  %762 = vmatmul.mubr.bf16.gmra.mrb[24].mxu1 %v1220_v42 }
  0x60   : > { %1109 = vmatprep.mubr.msk.bf16.mxu0 %vm561_vm0, %v1221_v43  ;;  %1117 = vmatprep.mubr.msk.bf16.mxu1 %vm561_vm0, %v1223_v44 }
  0x67   : > { %706 = vmatmul.mubr.bf16.gmra.mrb[28].mxu0 %v1225_v45  ;;  %770 = vmatmul.mubr.bf16.gmra.mrb[28].mxu1 %v1226_v46 }
 0x102   : > { %v651_v48 = vpop.f32.mrb[0].mxu0  ;;  %v715_v50 = vpop.f32.mrb[0].mxu1 }
 0x103   : > { %v785_v51 = vmul.f32 %v1387_v47, %v651_v48  ;;  %v801_v52 = vmul.f32 %v1387_v47, %v715_v50  ;;  %v653_v53 = vpop.f32.mrb[1].mxu0  ;;  %v717_v54 = vpop.f32.mrb[1].mxu1 }
 0x104   : > { %v654_v55 = vpop.f32.mrb[2].mxu0  ;;  %v718_v56 = vpop.f32.mrb[2].mxu1 }
 0x105   : > { %v824_v57 = vadd.f32 %v1392_v49, %v785_v51  ;;  %v840_v58 = vadd.f32 %v1392_v49, %v801_v52  ;;  %v786_v59 = vmul.f32 %v1387_v47, %v654_v55  ;;  %v802_v60 = vmul.f32 %v1387_v47, %v718_v56  ;;  %v656_v61 = vpop.f32.mrb[3].mxu0  ;;  %v720_v62 = vpop.f32.mrb[3].mxu1 }
 0x107   : > { %v856_v63 = vmax.f32 %v824_v57, 0.0  ;;  %v872_v0 = vmax.f32 %v840_v58, 0.0  ;;  %v825_v1 = vadd.f32 %v1392_v49, %v786_v59  ;;  %v841_v2 = vadd.f32 %v1392_v49, %v802_v60 }
 0x109   : > { %889 = vst.msk [vmem:[%s1405_s29] sm:$0xff] %vm888_vm3, %v856_v63  ;;  %905 = vst.msk [vmem:[%s1405_s29 + $0x80] sm:$0xff] %vm888_vm3, %v872_v0  ;;  %v857_v3 = vmax.f32 %v825_v1, 0.0  ;;  %v873_v4 = vmax.f32 %v841_v2, 0.0 }
 0x10a   : > { %v659_v5 = vpop.f32.mrb[4].mxu0  ;;  %v723_v6 = vpop.f32.mrb[4].mxu1 }
 0x10b   : > { %890 = vst.msk [vmem:[%s1405_s29 + $0x8] sm:$0xff] %vm888_vm3, %v857_v3  ;;  %906 = vst.msk [vmem:[%s1405_s29 + $0x88] sm:$0xff] %vm888_vm3, %v873_v4  ;;  %v787_v7 = vmul.f32 %v1387_v47, %v659_v5  ;;  %v803_v8 = vmul.f32 %v1387_v47, %v723_v6  ;;  %v661_v9 = vpop.f32.mrb[5].mxu0  ;;  %v725_v10 = vpop.f32.mrb[5].mxu1 }
 0x10c   : > { %v662_v11 = vpop.f32.mrb[6].mxu0  ;;  %v726_v12 = vpop.f32.mrb[6].mxu1 }
 0x10d   : > { %v826_v13 = vadd.f32 %v1392_v49, %v787_v7  ;;  %v842_v14 = vadd.f32 %v1392_v49, %v803_v8  ;;  %v788_v15 = vmul.f32 %v1387_v47, %v662_v11  ;;  %v804_v16 = vmul.f32 %v1387_v47, %v726_v12  ;;  %v664_v17 = vpop.f32.mrb[7].mxu0  ;;  %v728_v18 = vpop.f32.mrb[7].mxu1 }
 0x10f   : > { %v858_v19 = vmax.f32 %v826_v13, 0.0  ;;  %v874_v20 = vmax.f32 %v842_v14, 0.0  ;;  %v827_v21 = vadd.f32 %v1392_v49, %v788_v15  ;;  %v843_v22 = vadd.f32 %v1392_v49, %v804_v16 }
 0x111   : > { %891 = vst.msk [vmem:[%s1405_s29 + $0x10] sm:$0xff] %vm888_vm3, %v858_v19  ;;  %907 = vst.msk [vmem:[%s1405_s29 + $0x90] sm:$0xff] %vm888_vm3, %v874_v20  ;;  %v859_v23 = vmax.f32 %v827_v21, 0.0  ;;  %v875_v24 = vmax.f32 %v843_v22, 0.0 }
 0x112   : > { %v667_v25 = vpop.f32.mrb[8].mxu0  ;;  %v731_v26 = vpop.f32.mrb[8].mxu1 }
 0x113   : > { %892 = vst.msk [vmem:[%s1405_s29 + $0x18] sm:$0xff] %vm888_vm3, %v859_v23  ;;  %908 = vst.msk [vmem:[%s1405_s29 + $0x98] sm:$0xff] %vm888_vm3, %v875_v24  ;;  %v789_v27 = vmul.f32 %v1387_v47, %v667_v25  ;;  %v805_v28 = vmul.f32 %v1387_v47, %v731_v26  ;;  %v669_v29 = vpop.f32.mrb[9].mxu0  ;;  %v733_v30 = vpop.f32.mrb[9].mxu1 }
 0x114   : > { %v670_v31 = vpop.f32.mrb[10].mxu0  ;;  %v734_v32 = vpop.f32.mrb[10].mxu1 }
 0x115   : > { %v828_v33 = vadd.f32 %v1392_v49, %v789_v27  ;;  %v844_v34 = vadd.f32 %v1392_v49, %v805_v28  ;;  %v790_v35 = vmul.f32 %v1387_v47, %v670_v31  ;;  %v806_v36 = vmul.f32 %v1387_v47, %v734_v32  ;;  %v672_v37 = vpop.f32.mrb[11].mxu0  ;;  %v736_v38 = vpop.f32.mrb[11].mxu1 }
 0x117   : > { %v860_v39 = vmax.f32 %v828_v33, 0.0  ;;  %v876_v40 = vmax.f32 %v844_v34, 0.0  ;;  %v829_v41 = vadd.f32 %v1392_v49, %v790_v35  ;;  %v845_v42 = vadd.f32 %v1392_v49, %v806_v36 }
 0x119   : > { %893 = vst.msk [vmem:[%s1405_s29 + $0x20] sm:$0xff] %vm888_vm3, %v860_v39  ;;  %909 = vst.msk [vmem:[%s1405_s29 + $0xa0] sm:$0xff] %vm888_vm3, %v876_v40  ;;  %v861_v43 = vmax.f32 %v829_v41, 0.0  ;;  %v877_v44 = vmax.f32 %v845_v42, 0.0 }
 0x11a   : > { %v675_v45 = vpop.f32.mrb[12].mxu0  ;;  %v739_v46 = vpop.f32.mrb[12].mxu1 }
 0x11b   : > { %894 = vst.msk [vmem:[%s1405_s29 + $0x28] sm:$0xff] %vm888_vm3, %v861_v43  ;;  %910 = vst.msk [vmem:[%s1405_s29 + $0xa8] sm:$0xff] %vm888_vm3, %v877_v44  ;;  %v791_v48 = vmul.f32 %v1387_v47, %v675_v45  ;;  %v807_v50 = vmul.f32 %v1387_v47, %v739_v46  ;;  %v677_v51 = vpop.f32.mrb[13].mxu0  ;;  %v741_v52 = vpop.f32.mrb[13].mxu1 }
 0x11c   : > { %v678_v53 = vpop.f32.mrb[14].mxu0  ;;  %v742_v54 = vpop.f32.mrb[14].mxu1 }
 0x11d   : > { %v830_v55 = vadd.f32 %v1392_v49, %v791_v48  ;;  %v846_v56 = vadd.f32 %v1392_v49, %v807_v50  ;;  %v792_v57 = vmul.f32 %v1387_v47, %v678_v53  ;;  %v808_v58 = vmul.f32 %v1387_v47, %v742_v54  ;;  %v680_v59 = vpop.f32.mrb[15].mxu0  ;;  %v744_v60 = vpop.f32.mrb[15].mxu1 }
 0x11f   : > { %v862_v61 = vmax.f32 %v830_v55, 0.0  ;;  %v878_v62 = vmax.f32 %v846_v56, 0.0  ;;  %v831_v63 = vadd.f32 %v1392_v49, %v792_v57  ;;  %v847_v0 = vadd.f32 %v1392_v49, %v808_v58 }
 0x121   : > { %895 = vst.msk [vmem:[%s1405_s29 + $0x30] sm:$0xff] %vm888_vm3, %v862_v61  ;;  %911 = vst.msk [vmem:[%s1405_s29 + $0xb0] sm:$0xff] %vm888_vm3, %v878_v62  ;;  %v863_v1 = vmax.f32 %v831_v63, 0.0  ;;  %v879_v2 = vmax.f32 %v847_v0, 0.0 }
 0x122   : > { %v683_v3 = vpop.f32.mrb[16].mxu0  ;;  %v747_v4 = vpop.f32.mrb[16].mxu1 }
 0x123   : > { %896 = vst.msk [vmem:[%s1405_s29 + $0x38] sm:$0xff] %vm888_vm3, %v863_v1  ;;  %912 = vst.msk [vmem:[%s1405_s29 + $0xb8] sm:$0xff] %vm888_vm3, %v879_v2  ;;  %v793_v5 = vmul.f32 %v1387_v47, %v683_v3  ;;  %v809_v6 = vmul.f32 %v1387_v47, %v747_v4  ;;  %v685_v7 = vpop.f32.mrb[17].mxu0  ;;  %v749_v8 = vpop.f32.mrb[17].mxu1 }
 0x124   : > { %v686_v9 = vpop.f32.mrb[18].mxu0  ;;  %v750_v10 = vpop.f32.mrb[18].mxu1 }
 0x125   : > { %v832_v11 = vadd.f32 %v1392_v49, %v793_v5  ;;  %v848_v12 = vadd.f32 %v1392_v49, %v809_v6  ;;  %v794_v13 = vmul.f32 %v1387_v47, %v686_v9  ;;  %v810_v14 = vmul.f32 %v1387_v47, %v750_v10  ;;  %v688_v15 = vpop.f32.mrb[19].mxu0  ;;  %v752_v16 = vpop.f32.mrb[19].mxu1 }
 0x127   : > { %v864_v17 = vmax.f32 %v832_v11, 0.0  ;;  %v880_v18 = vmax.f32 %v848_v12, 0.0  ;;  %v833_v19 = vadd.f32 %v1392_v49, %v794_v13  ;;  %v849_v20 = vadd.f32 %v1392_v49, %v810_v14 }
 0x129   : > { %897 = vst.msk [vmem:[%s1405_s29 + $0x40] sm:$0xff] %vm888_vm3, %v864_v17  ;;  %913 = vst.msk [vmem:[%s1405_s29 + $0xc0] sm:$0xff] %vm888_vm3, %v880_v18  ;;  %v865_v21 = vmax.f32 %v833_v19, 0.0  ;;  %v881_v22 = vmax.f32 %v849_v20, 0.0 }
 0x12a   : > { %v691_v23 = vpop.f32.mrb[20].mxu0  ;;  %v755_v24 = vpop.f32.mrb[20].mxu1 }
 0x12b   : > { %898 = vst.msk [vmem:[%s1405_s29 + $0x48] sm:$0xff] %vm888_vm3, %v865_v21  ;;  %914 = vst.msk [vmem:[%s1405_s29 + $0xc8] sm:$0xff] %vm888_vm3, %v881_v22  ;;  %v795_v25 = vmul.f32 %v1387_v47, %v691_v23  ;;  %v811_v26 = vmul.f32 %v1387_v47, %v755_v24  ;;  %v693_v27 = vpop.f32.mrb[21].mxu0  ;;  %v757_v28 = vpop.f32.mrb[21].mxu1 }
 0x12c   : > { %v694_v29 = vpop.f32.mrb[22].mxu0  ;;  %v758_v30 = vpop.f32.mrb[22].mxu1 }
 0x12d   : > { %v834_v31 = vadd.f32 %v1392_v49, %v795_v25  ;;  %v850_v32 = vadd.f32 %v1392_v49, %v811_v26  ;;  %v796_v33 = vmul.f32 %v1387_v47, %v694_v29  ;;  %v812_v34 = vmul.f32 %v1387_v47, %v758_v30  ;;  %v696_v35 = vpop.f32.mrb[23].mxu0  ;;  %v760_v36 = vpop.f32.mrb[23].mxu1 }
 0x12f   : > { %v866_v37 = vmax.f32 %v834_v31, 0.0  ;;  %v882_v38 = vmax.f32 %v850_v32, 0.0  ;;  %v835_v39 = vadd.f32 %v1392_v49, %v796_v33  ;;  %v851_v40 = vadd.f32 %v1392_v49, %v812_v34 }
 0x131   : > { %899 = vst.msk [vmem:[%s1405_s29 + $0x50] sm:$0xff] %vm888_vm3, %v866_v37  ;;  %915 = vst.msk [vmem:[%s1405_s29 + $0xd0] sm:$0xff] %vm888_vm3, %v882_v38  ;;  %v867_v41 = vmax.f32 %v835_v39, 0.0  ;;  %v883_v42 = vmax.f32 %v851_v40, 0.0 }
 0x132   : > { %v699_v43 = vpop.f32.mrb[24].mxu0  ;;  %v763_v44 = vpop.f32.mrb[24].mxu1 }
 0x133   : > { %900 = vst.msk [vmem:[%s1405_s29 + $0x58] sm:$0xff] %vm888_vm3, %v867_v41  ;;  %916 = vst.msk [vmem:[%s1405_s29 + $0xd8] sm:$0xff] %vm888_vm3, %v883_v42  ;;  %v797_v45 = vmul.f32 %v1387_v47, %v699_v43  ;;  %v813_v46 = vmul.f32 %v1387_v47, %v763_v44  ;;  %v701_v48 = vpop.f32.mrb[25].mxu0  ;;  %v765_v50 = vpop.f32.mrb[25].mxu1 }
 0x134   : > { %v702_v51 = vpop.f32.mrb[26].mxu0  ;;  %v766_v52 = vpop.f32.mrb[26].mxu1 }
 0x135   : > { %v836_v53 = vadd.f32 %v1392_v49, %v797_v45  ;;  %v852_v54 = vadd.f32 %v1392_v49, %v813_v46  ;;  %v798_v55 = vmul.f32 %v1387_v47, %v702_v51  ;;  %v814_v56 = vmul.f32 %v1387_v47, %v766_v52  ;;  %v704_v57 = vpop.f32.mrb[27].mxu0  ;;  %v768_v58 = vpop.f32.mrb[27].mxu1 }
 0x137   : > { %v868_v59 = vmax.f32 %v836_v53, 0.0  ;;  %v884_v60 = vmax.f32 %v852_v54, 0.0  ;;  %v837_v61 = vadd.f32 %v1392_v49, %v798_v55  ;;  %v853_v62 = vadd.f32 %v1392_v49, %v814_v56 }
 0x139   : > { %901 = vst.msk [vmem:[%s1405_s29 + $0x60] sm:$0xff] %vm888_vm3, %v868_v59  ;;  %917 = vst.msk [vmem:[%s1405_s29 + $0xe0] sm:$0xff] %vm888_vm3, %v884_v60  ;;  %v869_v63 = vmax.f32 %v837_v61, 0.0  ;;  %v885_v0 = vmax.f32 %v853_v62, 0.0 }
 0x13a   : > { %v707_v1 = vpop.f32.mrb[28].mxu0  ;;  %v771_v2 = vpop.f32.mrb[28].mxu1 }
 0x13b   : > { %902 = vst.msk [vmem:[%s1405_s29 + $0x68] sm:$0xff] %vm888_vm3, %v869_v63  ;;  %918 = vst.msk [vmem:[%s1405_s29 + $0xe8] sm:$0xff] %vm888_vm3, %v885_v0  ;;  %v799_v3 = vmul.f32 %v1387_v47, %v707_v1  ;;  %v815_v4 = vmul.f32 %v1387_v47, %v771_v2  ;;  %v709_v5 = vpop.f32.mrb[29].mxu0  ;;  %v773_v6 = vpop.f32.mrb[29].mxu1 }
 0x13c   : > { %v710_v7 = vpop.f32.mrb[30].mxu0  ;;  %v774_v8 = vpop.f32.mrb[30].mxu1 }
 0x13d   : > { %v838_v9 = vadd.f32 %v1392_v49, %v799_v3  ;;  %v854_v10 = vadd.f32 %v1392_v49, %v815_v4  ;;  %v800_v11 = vmul.f32 %v1387_v47, %v710_v7  ;;  %v816_v12 = vmul.f32 %v1387_v47, %v774_v8  ;;  %v712_v13 = vpop.f32.mrb[31].mxu0  ;;  %v776_v14 = vpop.f32.mrb[31].mxu1 }
 0x13f   : > { %v870_v15 = vmax.f32 %v838_v9, 0.0  ;;  %v886_v16 = vmax.f32 %v854_v10, 0.0  ;;  %v839_v17 = vadd.f32 %v1392_v49, %v800_v11  ;;  %v855_v18 = vadd.f32 %v1392_v49, %v816_v12 }
 0x141   : > { %903 = vst.msk [vmem:[%s1405_s29 + $0x70] sm:$0xff] %vm888_vm3, %v870_v15  ;;  %919 = vst.msk [vmem:[%s1405_s29 + $0xf0] sm:$0xff] %vm888_vm3, %v886_v16  ;;  %v871_v19 = vmax.f32 %v839_v17, 0.0  ;;  %v887_v20 = vmax.f32 %v855_v18, 0.0 }
 0x143   : > { %904 = vst.msk [vmem:[%s1405_s29 + $0x78] sm:$0xff] %vm888_vm3, %v871_v19  ;;  %920 = vst.msk [vmem:[%s1405_s29 + $0xf8] sm:$0xff] %vm888_vm3, %v887_v20 }
 0x144 PF: > { %s14_s17 = sadd.s32 1, %s1249_s17   ;;  %s1543_s15 = smov %s1245_s16 }
 0x145   : > { %p11_p5 = scmp.ge.s32.totalorder %s14_s17, 4   ;;  %s1544_s16 = smov %s1546_s18 }
 0x147   :  { %13 = sbr.rel (!%p11_p5) target bundleno = 2 (0x2), region = 75 }

</bundles_post_ra>
